<compile_context>
chip_gen: v7x
topology: tpu7x:2x2x1
jax: 0.10.0
libtpu: 0.0.40
codegen_flags: <defaults>
</compile_context>

<pallas_src>
import math
import functools

import jax
import jax.numpy as jnp
from jax import lax
from jax.experimental import pallas as pl
from jax.experimental.pallas import tpu as pltpu


# ----------------------------------------------------------------------------
# Tile-size helpers (exact tiling; blocks either full-dim or multiple of 8).
# ----------------------------------------------------------------------------
def _row_tile(n, cap=256):
    """Largest row tile that exactly divides n: full array if small, else a multiple of 8."""
    if n <= cap:
        return n
    best = None
    for d in range(8, cap + 1, 8):
        if n % d == 0:
            best = d
    return best if best is not None else n


def _time_block(s, cap=16):
    """Largest divisor of s up to cap (timesteps per recurrent grid step)."""
    for d in range(min(s, cap), 0, -1):
        if s % d == 0:
            return d
    return s


# ----------------------------------------------------------------------------
# Row-tiled GEMM + bias (used for the hoisted LSTM input projection).
# ----------------------------------------------------------------------------
def _matmul_bias_kernel(x_ref, w_ref, b_ref, o_ref):
    o_ref[...] = (jnp.dot(x_ref[...].astype(w_ref.dtype), w_ref[...],
                          preferred_element_type=jnp.float32)
                  + b_ref[...])


def matmul_bias(x, w, b, row_cap=256):
    """x: (N, K) f32; w: (K, M) bf16; b: (1, M) f32  ->  (N, M) f32."""
    N, K = x.shape
    M = w.shape[1]
    n_t = _row_tile(N, row_cap)
    return pl.pallas_call(
        _matmul_bias_kernel,
        out_shape=jax.ShapeDtypeStruct((N, M), jnp.float32),
        grid_spec=pltpu.PrefetchScalarGridSpec(
            num_scalar_prefetch=0,
            grid=(N // n_t,),
            in_specs=[pl.BlockSpec((n_t, K), lambda i: (i, 0)),
                      pl.BlockSpec((K, M), lambda i: (0, 0)),
                      pl.BlockSpec((1, M), lambda i: (0, 0))],
            out_specs=pl.BlockSpec((n_t, M), lambda i: (i, 0))),
        compiler_params=pltpu.CompilerParams(
            dimension_semantics=("parallel",)),
    )(x, w, b)


# ----------------------------------------------------------------------------
# LSTM recurrence kernel: grid over time BLOCKS; h/c carried in VMEM scratch.
# The time-parallel gates_x = x @ W_ih + bias is already precomputed, so only
# the sequential h @ W_hh matmul remains inside the loop.
# ----------------------------------------------------------------------------
def _lstm_recurrence_kernel(gx_ref, whh_ref, h0_ref, c0_ref,
                            out_ref, hT_ref, cT_ref, h_scr, c_scr):
    tb = pl.program_id(0)

    @pl.when(tb == 0)
    def _():
        h_scr[...] = h0_ref[...]
        c_scr[...] = c0_ref[...]

    H = h_scr.shape[1]
    whh = whh_ref[...]                                   # (H, 4H) bf16
    t_block = out_ref.shape[0]

    def step(tt, carry):
        h, c = carry                                     # (B, H) f32 each
        gates = gx_ref[tt] + jnp.dot(h.astype(whh.dtype), whh,
                                     preferred_element_type=jnp.float32)
        # PyTorch gate order [i, f, g, o].
        # TODO(synk): at real H (non-multiple of 128) these lane slices are masked;
        # a (4, H)-blocked gate layout would make them lane-dense.
        i_g = jax.nn.sigmoid(gates[:, 0 * H:1 * H])
        f_g = jax.nn.sigmoid(gates[:, 1 * H:2 * H])
        g_g = jnp.tanh(gates[:, 2 * H:3 * H])
        o_g = jax.nn.sigmoid(gates[:, 3 * H:4 * H])
        c_new = f_g * c + i_g * g_g
        h_new = o_g * jnp.tanh(c_new)
        out_ref[tt] = h_new
        return h_new, c_new

    h, c = lax.fori_loop(0, t_block, step, (h_scr[...], c_scr[...]), unroll=True)
    h_scr[...] = h
    c_scr[...] = c

    @pl.when(tb == pl.num_programs(0) - 1)
    def _():
        hT_ref[...] = h
        cT_ref[...] = c


def _lstm_recurrence(gx, w_hh_t, h0, c0, t_block):
    """gx: (S, B, 4H) f32; w_hh_t: (H, 4H) bf16; h0, c0: (B, H) f32."""
    S, B, H4 = gx.shape
    H = h0.shape[1]
    out, hT, cT = pl.pallas_call(
        _lstm_recurrence_kernel,
        out_shape=(jax.ShapeDtypeStruct((S, B, H), jnp.float32),
                   jax.ShapeDtypeStruct((B, H), jnp.float32),
                   jax.ShapeDtypeStruct((B, H), jnp.float32)),
        grid_spec=pltpu.PrefetchScalarGridSpec(
            num_scalar_prefetch=0,
            grid=(S // t_block,),
            in_specs=[pl.BlockSpec((t_block, B, H4), lambda t: (t, 0, 0)),
                      pl.BlockSpec((H, H4), lambda t: (0, 0)),
                      pl.BlockSpec((B, H), lambda t: (0, 0)),
                      pl.BlockSpec((B, H), lambda t: (0, 0))],
            out_specs=[pl.BlockSpec((t_block, B, H), lambda t: (t, 0, 0)),
                       pl.BlockSpec((B, H), lambda t: (0, 0)),
                       pl.BlockSpec((B, H), lambda t: (0, 0))],
            scratch_shapes=[pltpu.VMEM((B, H), jnp.float32),
                            pltpu.VMEM((B, H), jnp.float32)]),
        compiler_params=pltpu.CompilerParams(
            dimension_semantics=("arbitrary",)),
    )(gx, w_hh_t, h0, c0)
    return out, hT, cT


def lstm_layer(x, lp, h0, c0):
    """x: (S, B, Din) f32. Returns (out (S,B,H), hT, cT)."""
    S, B, Din = x.shape
    H = h0.shape[1]
    # Hoisted time-parallel input projection (one large GEMM over all timesteps).
    gx = matmul_bias(x.reshape(S * B, Din), lp["w_ih_t"], lp["bias"]).reshape(S, B, 4 * H)
    t_block = _time_block(S)
    return _lstm_recurrence(gx, lp["w_hh_t"], h0, c0, t_block)


# ----------------------------------------------------------------------------
# MoS head kernel (row-tiled): latent -> shared decoder -> per-expert softmax
# -> stick-breaking mixture, with the final log fused in-kernel.
# ----------------------------------------------------------------------------
def _mos_head_kernel(h_ref, wlat_ref, blat_ref, wdec_ref, bdec_ref,
                     wred_ref, bred_ref,
                     logprob_ref, mu_ref, logvar_ref, *, n_experts, ninp):
    h = h_ref[...]                                        # (N_T, nhidlast) f32
    n_rows = h.shape[0]
    h_bf = h.astype(wlat_ref.dtype)

    # reduce(output) -> mu / logvar (nn.Linear(nhidlast, 2*(E-1)))
    mulogvar = (jnp.dot(h_bf, wred_ref[...], preferred_element_type=jnp.float32)
                + bred_ref[...])                          # (N_T, 2(E-1))
    mu = mulogvar[:, :n_experts - 1]
    logvar = mulogvar[:, n_experts - 1:]
    mu_ref[...] = mu
    logvar_ref[...] = logvar

    # Eval mode: reparameterize() returns mu; stick-breaking prior from sigmoid(mu),
    # with an implicit trailing vs = 1 for the last expert (matches the cumprod/R trick).
    vs = jax.nn.sigmoid(mu)                               # (N_T, E-1)

    # Batched latent projection: one wide GEMM instead of E narrow ones.
    latent_all = jnp.tanh(
        jnp.dot(h_bf, wlat_ref[...], preferred_element_type=jnp.float32)
        + blat_ref[...]).astype(wdec_ref.dtype)           # (N_T, E*ninp)

    wdec = wdec_ref[...]                                  # (ninp, ntoken) bf16
    bdec = bdec_ref[...]                                  # (1, ntoken) f32

    running = jnp.ones((n_rows, 1), jnp.float32)          # prod_{i<e} (1 - vs_i)
    for e in range(n_experts):
        latent_e = latent_all[:, e * ninp:(e + 1) * ninp]
        logit_e = (jnp.dot(latent_e, wdec, preferred_element_type=jnp.float32)
                   + bdec)                                # (N_T, ntoken)
        m = jnp.max(logit_e, axis=-1, keepdims=True)
        p = jnp.exp(logit_e - m)
        p = p * pl.reciprocal(jnp.sum(p, axis=-1, keepdims=True), approx=True)

        if e < n_experts - 1:
            vs_e = vs[:, e:e + 1]
        else:
            vs_e = jnp.ones((n_rows, 1), jnp.float32)
        pi_e = running * vs_e                             # stick-breaking weight

        if e == 0:
            logprob_ref[...] = pi_e * p                   # accumulate in the output block
        else:
            logprob_ref[...] += pi_e * p
        running = running * (1.0 - vs_e)

    # Fused final log (matches torch.log(prob.add_(1e-8))).
    logprob_ref[...] = jnp.log(logprob_ref[...] + 1e-8)


def mos_head(h_flat, head, ntoken, n_experts):
    """h_flat: (N, nhidlast) f32. Returns (log_prob (N, ntoken), mu, logvar)."""
    N, nhidlast = h_flat.shape
    ninp = head["w_dec"].shape[0]
    n_t = _row_tile(N)
    kernel = functools.partial(_mos_head_kernel, n_experts=n_experts, ninp=ninp)
    # TODO(synk): at very large vocabularies the vocab axis should also be tiled
    # (two-pass/online softmax) so the (N_T, ntoken) blocks stay within VMEM on v7x.
    log_prob, mu, logvar = pl.pallas_call(
        kernel,
        out_shape=(jax.ShapeDtypeStruct((N, ntoken), jnp.float32),
                   jax.ShapeDtypeStruct((N, n_experts - 1), jnp.float32),
                   jax.ShapeDtypeStruct((N, n_experts - 1), jnp.float32)),
        grid_spec=pltpu.PrefetchScalarGridSpec(
            num_scalar_prefetch=0,
            grid=(N // n_t,),
            in_specs=[pl.BlockSpec((n_t, nhidlast), lambda i: (i, 0)),
                      pl.BlockSpec(head["w_lat"].shape, lambda i: (0, 0)),
                      pl.BlockSpec(head["b_lat"].shape, lambda i: (0, 0)),
                      pl.BlockSpec(head["w_dec"].shape, lambda i: (0, 0)),
                      pl.BlockSpec(head["b_dec"].shape, lambda i: (0, 0)),
                      pl.BlockSpec(head["w_red"].shape, lambda i: (0, 0)),
                      pl.BlockSpec(head["b_red"].shape, lambda i: (0, 0))],
            out_specs=[pl.BlockSpec((n_t, ntoken), lambda i: (i, 0)),
                       pl.BlockSpec((n_t, n_experts - 1), lambda i: (i, 0)),
                       pl.BlockSpec((n_t, n_experts - 1), lambda i: (i, 0))]),
        compiler_params=pltpu.CompilerParams(
            dimension_semantics=("parallel",)),   # v7x megacore splits row tiles
    )(h_flat, head["w_lat"], head["b_lat"], head["w_dec"], head["b_dec"],
      head["w_red"], head["b_red"])
    return log_prob, mu, logvar


# ----------------------------------------------------------------------------
# Full RNNModel forward (eval mode).
# ----------------------------------------------------------------------------
def rnn_model_forward(params, tokens, hidden, *, nlayers, ntoken, n_experts):
    seq, batch = tokens.shape
    # Embedding lookup is a gather -> plain JAX glue.
    emb = jnp.take(params["embedding"], tokens, axis=0)   # (S, B, ninp)
    # TODO(synk): embedded_dropout / LockedDropout / WeightDrop are identity in eval mode.

    x = emb
    new_hidden = []
    for l in range(nlayers):
        h0, c0 = hidden[l]
        x, hT, cT = lstm_layer(x, params["lstm"][l], h0, c0)
        new_hidden.append((hT, cT))

    output = x                                            # (S, B, nhidlast)
    h_flat = output.reshape(seq * batch, output.shape[-1])

    log_prob_flat, mu, logvar = mos_head(h_flat, params["head"], ntoken, n_experts)
    model_output = log_prob_flat.reshape(seq, batch, ntoken)
    return model_output, new_hidden, mu, logvar


# ----------------------------------------------------------------------------
# Deterministic synthetic parameter initialization (shapes from __init__).
# Weights bf16 (halved HBM/VMEM traffic, bf16 MXU path); biases/activations f32.
# ----------------------------------------------------------------------------
def init_params(key, ntoken, ninp, nhid, nhidlast, nlayers, n_experts):
    def uni(k, shape, a):
        return jax.random.uniform(k, shape, jnp.float32, -a, a)

    keys = iter(jax.random.split(key, 64))
    params = {}
    params["embedding"] = uni(next(keys), (ntoken, ninp), 0.1)

    lstm_params = []
    for l in range(nlayers):
        in_dim = ninp if l == 0 else nhid
        hid = nhid if l != nlayers - 1 else nhidlast
        stdv = 1.0 / math.sqrt(hid)
        w_ih_t = uni(next(keys), (in_dim, 4 * hid), stdv).astype(jnp.bfloat16)   # W_ih^T
        w_hh_t = uni(next(keys), (hid, 4 * hid), stdv).astype(jnp.bfloat16)      # W_hh^T
        b_ih = uni(next(keys), (1, 4 * hid), stdv)
        b_hh = uni(next(keys), (1, 4 * hid), stdv)
        lstm_params.append({"w_ih_t": w_ih_t, "w_hh_t": w_hh_t, "bias": b_ih + b_hh})
    params["lstm"] = lstm_params

    # MoS head: latent Linear(nhidlast, E*ninp)+Tanh, decoder Linear(ninp, ntoken),
    # reduce Linear(nhidlast, 2*(E-1)) split into mu / logvar.
    lat_std = 1.0 / math.sqrt(nhidlast)
    red_std = 1.0 / math.sqrt(nhidlast)
    params["head"] = {
        "w_lat": uni(next(keys), (nhidlast, n_experts * ninp), lat_std).astype(jnp.bfloat16),
        "b_lat": uni(next(keys), (1, n_experts * ninp), lat_std),
        "w_dec": uni(next(keys), (ninp, ntoken), 0.1).astype(jnp.bfloat16),
        "b_dec": jnp.zeros((1, ntoken), jnp.float32),
        "w_red": uni(next(keys), (nhidlast, 2 * (n_experts - 1)), red_std).astype(jnp.bfloat16),
        "b_red": uni(next(keys), (1, 2 * (n_experts - 1)), red_std),
    }
    return params


def init_hidden(batch, nhid, nhidlast, nlayers):
    hs = []
    for l in range(nlayers):
        h = nhid if l != nlayers - 1 else nhidlast
        hs.append((jnp.zeros((batch, h), jnp.float32),
                   jnp.zeros((batch, h), jnp.float32)))
    return hs


if __name__ == "__main__":
    ntoken, ninp, nhid, nhidlast = 32, 16, 32, 16
    nlayers, n_experts = 2, 4
    seq, batch = 8, 2

    key = jax.random.PRNGKey(0)
    k_param, k_tok = jax.random.split(key)
    params = init_params(k_param, ntoken, ninp, nhid, nhidlast, nlayers, n_experts)
    tokens = jax.random.randint(k_tok, (seq, batch), 0, ntoken, dtype=jnp.int32)
    hidden = init_hidden(batch, nhid, nhidlast, nlayers)

    fwd = functools.partial(rnn_model_forward, nlayers=nlayers, ntoken=ntoken,
                            n_experts=n_experts)
    model_output, new_hidden, mu, logvar = fwd(params, tokens, hidden)
    jax.block_until_ready(model_output)

    assert model_output.shape == (seq, batch, ntoken)
    assert mu.shape == (seq * batch, n_experts - 1)
    assert logvar.shape == (seq * batch, n_experts - 1)
    assert new_hidden[0][0].shape == (batch, nhid)
    assert new_hidden[-1][0].shape == (batch, nhidlast)
    # mixture probabilities must sum to ~1 per row (before the log); tolerance accounts
    # for bf16 weights and the approximate EUP reciprocal in the softmax.
    row_sums = jnp.sum(jnp.exp(model_output), axis=-1)
    assert bool(jnp.all(jnp.abs(row_sums - 1.0) < 1e-2))

    print("KERNEL_OK")
</pallas_src>

<mosaic_0001>
module attributes {stable_mosaic.version = 11 : i64} {
  func.func @_matmul_bias_kernel(%arg0: i32, %arg1: memref<16x16xf32, #tpu.memory_space<vmem>>, %arg2: memref<16x128xbf16, #tpu.memory_space<vmem>>, %arg3: memref<1x128xf32, #tpu.memory_space<vmem>>, %arg4: memref<16x128xf32, #tpu.memory_space<vmem>>) attributes {dimension_semantics = [#tpu.dimension_semantics<parallel>], iteration_bounds = array<i64: 1>, scalar_prefetch = 0 : i64, scratch_operands = 0 : i64, tpu.core_type = #tpu.core_type<tc>, window_params = [{transform_indices = @transform_0, window_bounds = array<i64: 16, 16>}, {pipeline_mode = #tpu.pipeline_mode<synchronous>, transform_indices = @transform_1, window_bounds = array<i64: 16, 128>}, {pipeline_mode = #tpu.pipeline_mode<synchronous>, transform_indices = @transform_2, window_bounds = array<i64: 1, 128>}, {transform_indices = @transform_3, window_bounds = array<i64: 16, 128>}]} {
    %c0 = arith.constant 0 : index
    %c0_0 = arith.constant 0 : index
    %0 = vector.load %arg1[%c0, %c0_0] : memref<16x16xf32, #tpu.memory_space<vmem>>, vector<16x16xf32>
    %1 = arith.truncf %0 : vector<16x16xf32> to vector<16x16xbf16>
    %c0_1 = arith.constant 0 : index
    %c0_2 = arith.constant 0 : index
    %2 = vector.load %arg2[%c0_1, %c0_2] : memref<16x128xbf16, #tpu.memory_space<vmem>>, vector<16x128xbf16>
    %cst = arith.constant dense<0.000000e+00> : vector<16x128xf32>
    %3 = tpu.matmul %1, %2, %cst {dimension_numbers = #tpu.dot_dimension_numbers<[1], [0], [0], [1], [0, 0, 1, 1], [], []>} : vector<16x16xbf16>, vector<16x128xbf16>, vector<16x128xf32> -> vector<16x128xf32>
    %c0_3 = arith.constant 0 : index
    %c0_4 = arith.constant 0 : index
    %4 = vector.load %arg3[%c0_3, %c0_4] : memref<1x128xf32, #tpu.memory_space<vmem>>, vector<1x128xf32>
    %5 = vector.broadcast %4 : vector<1x128xf32> to vector<16x128xf32>
    %6 = arith.addf %3, %5 : vector<16x128xf32>
    %c0_5 = arith.constant 0 : index
    %c0_6 = arith.constant 0 : index
    %7 = vector.load %arg4[%c0_5, %c0_6] : memref<16x128xf32, #tpu.memory_space<vmem>>, vector<16x128xf32>
    tpu.vector_store %arg4[%c0_5, %c0_6], %6 {strides = array<i32>} : memref<16x128xf32, #tpu.memory_space<vmem>>, vector<16x128xf32>,
    return
  }
  func.func @transform_0(%arg0: i32) -> (i32, i32) {
    %c0_i32 = arith.constant 0 : i32
    %c0_i32_0 = arith.constant 0 : i32
    return %arg0, %c0_i32 : i32, i32
  }
  func.func @transform_1(%arg0: i32) -> (i32, i32) {
    %c0_i32 = arith.constant 0 : i32
    %c0_i32_0 = arith.constant 0 : i32
    %c0_i32_1 = arith.constant 0 : i32
    return %c0_i32, %c0_i32_0 : i32, i32
  }
  func.func @transform_2(%arg0: i32) -> (i32, i32) {
    %c0_i32 = arith.constant 0 : i32
    %c0_i32_0 = arith.constant 0 : i32
    %c0_i32_1 = arith.constant 0 : i32
    return %c0_i32, %c0_i32_0 : i32, i32
  }
  func.func @transform_3(%arg0: i32) -> (i32, i32) {
    %c0_i32 = arith.constant 0 : i32
    %c0_i32_0 = arith.constant 0 : i32
    return %arg0, %c0_i32 : i32, i32
  }
}

</mosaic_0001>

<bundles_post_ra>
// kernel: tpu_custom_call.1
= control target key start
LH: loop header
LB: loop body
LE: loop exit
PB: predicated region body
PF: predicated region fallthrough
CT: control target
= control target key end

     0   :  { %8 = vsyncpa [#allocation3], 0  ;;  %s294_s0 = inlined_call_operand.hbm [shape: f32[16,16], index: 0, kind: input, shape index: {}]   ;;  %s295_s1 = inlined_call_operand.hbm [shape: bf16[16,128], index: 1, kind: input, shape index: {}]   ;;  %s296_s2 = inlined_call_operand.vmem [shape: f32[1,128], index: 2, kind: input, shape index: {}]   ;;  %s297_s3 = inlined_call_operand.hbm [shape: f32[16,128], index: 3, kind: output, shape index: {}]  }
   0x1   :  { %9 = vsyncpa [#allocation6], 0 }
   0x2   :  { %10 = vsyncpa [#allocation4], 0  ;;  %s220_s12 = smov [#allocation2]   ;;  %s148_s16 = scalar_lea.hbm %s294_s0, 256 }
   0x3   :  { %s16_s13 = sshll.u32 %s220_s12, 4  ;;  %p149_p0 = scmp.ne.s32.totalorder %s294_s0, %s148_s16  ;;  %s17_s13 = int_to_ptr.vmem [resolvable:$true] %s16_s13 }
   0x4   :  { %p152_p1 = scmp.lt.u32.totalorder %s148_s16, %s294_s0 }
   0x6   :  { %p154_p2 = pnand %p152_p1, %p149_p0 }
   0x8   :  { %157 = shalt.err (!%p154_p2)
}
   0x9   :  { %s158_s21 = scalar_lea.vmem %s17_s13, 256  ;;  %p163_p4 = scmp.lt.s32.totalorder %s17_s13, %s17_s13 }
   0xa   :  { %p159_p3 = scmp.ne.s32.totalorder %s17_s13, %s158_s21  ;;  %p164_p5 = scmp.lt.s32.totalorder %s158_s21, %s158_s21 }
   0xc   :  { %p165_p6 = por %p164_p5, %p163_p4 }
   0xe   :  { %p166_p7 = pnand %p165_p6, %p159_p3 }
  0x10   :  { %169 = shalt.err (!%p166_p7)
}
  0x11   :  { %s221_s22 = smov 128   ;;  %s222_s23 = smov 8  }
  0x12   :  { %22 = dma.hbm_to_vmem [thread:$0]  %s294_s0, 256, %s17_s13, [#allocation3], %s221_s22, %s221_s22, %s222_s23  }
  0x13   :  { %s223_s26 = smov [#allocation5]   ;;  %s170_s30 = scalar_lea.hbm %s295_s1, 128 }
  0x14   :  { %s28_s27 = sshll.u32 %s223_s26, 4  ;;  %p171_p8 = scmp.ne.s32.totalorder %s295_s1, %s170_s30  ;;  %s29_s27 = int_to_ptr.vmem [resolvable:$true] %s28_s27 }
  0x15   :  { %p174_p9 = scmp.lt.u32.totalorder %s170_s30, %s295_s1 }
  0x17   :  { %p176_p10 = pnand %p174_p9, %p171_p8 }
  0x19   :  { %179 = shalt.err (!%p176_p10)
}
  0x1a   :  { %s180_s8 = scalar_lea.vmem %s29_s27, 128  ;;  %p185_p12 = scmp.lt.s32.totalorder %s29_s27, %s29_s27 }
  0x1b   :  { %p181_p11 = scmp.ne.s32.totalorder %s29_s27, %s180_s8  ;;  %p186_p13 = scmp.lt.s32.totalorder %s180_s8, %s180_s8 }
  0x1d   :  { %p187_p0 = por %p186_p13, %p185_p12 }
  0x1f   :  { %p188_p1 = pnand %p187_p0, %p181_p11 }
  0x21   :  { %191 = shalt.err (!%p188_p1)
}
  0x22   :  { %s224_s0 = smov 64   ;;  %s225_s9 = smov 4  }
  0x23   :  { %34 = dma.hbm_to_vmem [thread:$0]  %s295_s1, 128, %s29_s27, [#allocation6], %s224_s0, %s224_s0, %s225_s9  }
  0x24   :  { %214 = dma.done.wait [#allocation3], 256  }
  0x25   :  { %215 = vsyncadd [#allocation3], 4294967040 }
  0x26   :  { %216 = dma.done.wait [#allocation6], 128  }
  0x27   :  { %217 = vsyncadd [#allocation6], 4294967168  ;;  %v226_v0 = vmov 0.0   ;;  %vm227_vm0 = vmmov 0   ;;  %v147_v1 = vld [vmem:[#allocation5] sm:$0xff]   ;;  %v44_v2 = vld [vmem:[#allocation2] sm:$0xff] }
  0x28   :  { %132 = vmatprep.subr.bf16.mxu0 %v226_v0  ;;  %134 = vmatprep.mubr.msk.bf16.mxu0 %vm227_vm0, %v226_v0  ;;  %v45_v3 = vld [vmem:[#allocation2 + $0x8] sm:$0xff]  ;;  %vm62_vm1 = vcmask 130048   ;;  %v127_v5 = vld [vmem:[%s296_s2] ss:$0 sm:$0xff]  ;;  %s228_s1 = smov [#allocation7]  }
  0x29   :  { %133 = vmatpush3.bf16.msra.mxu0 %v147_v1  ;;  %v46_v4 = vpack.c.bf16 %v45_v3, %v44_v2  ;;  %s114_s14 = sshll.u32 %s228_s1, 4  ;;  %s115_s14 = int_to_ptr.vmem [resolvable:$true] %s114_s14 }
  0x2a   :  { %s192_s15 = scalar_lea.vmem %s115_s14, 256  ;;  %p197_p3 = scmp.lt.s32.totalorder %s115_s14, %s115_s14 }
  0x2b   :  { %p193_p2 = scmp.ne.s32.totalorder %s115_s14, %s192_s15  ;;  %p198_p4 = scmp.lt.s32.totalorder %s192_s15, %s192_s15 }
  0x2c   :  { %135 = vmatmul.mubr.msk.bf16.vlgmr.msra.gmra.mrb[0].mxu0 %vm62_vm1, %v46_v4 }
  0x2d   :  { %p199_p5 = por %p198_p4, %p197_p3 }
  0x2f   :  { %p200_p6 = pnand %p199_p5, %p193_p2 }
  0xff   :  { %v100_v6 = vpop.f32.mrb[0].mxu0 }
 0x100   :  { %v101_v7 = vadd.f32 %v127_v5, %v100_v6  ;;  %v136_v8 = vpop.f32.mrb[1].mxu0 }
 0x101   :  { %v103_v9 = vpop.f32.mrb[2].mxu0 }
 0x102   :  { %107 = vst [vmem:[#allocation7] sm:$0xff] %v101_v7  ;;  %v104_v10 = vadd.f32 %v127_v5, %v103_v9  ;;  %v137_v11 = vpop.f32.mrb[3].mxu0 }
 0x104   :  { %108 = vst [vmem:[#allocation7 + $0x8] sm:$0xff] %v104_v10 }
 0x105   :  { %203 = shalt.err (!%p200_p6)
}
 0x106   :  { %s204_s17 = scalar_lea.hbm %s297_s3, 256 }
 0x107   :  { %p205_p7 = scmp.ne.s32.totalorder %s297_s3, %s204_s17  ;;  %p208_p8 = scmp.lt.u32.totalorder %s204_s17, %s297_s3 }
 0x109   :  { %p210_p9 = pnand %p208_p8, %p205_p7 }
 0x10b   :  { %213 = shalt.err (!%p210_p9)
}
 0x10c   :  { %120 = dma.vmem_to_hbm [thread:$0]  %s115_s14, 256, %s297_s3, [#allocation4], %s221_s22, %s221_s22, %s222_s23  }
 0x10d   :  { %218 = dma.done.wait [#allocation4], 256  }
 0x10e   :  { %219 = vsyncadd [#allocation4], 4294967040 }
 0x10f   :  { %124 = vsyncpa [#allocation3], 1 }
 0x110   :  { %125 = vsyncpa [#allocation6], 1 }
 0x111   :  { %126 = vsyncpa [#allocation4], 1 }

</bundles_post_ra>
